<compile_context>
chip_gen: v6e
topology: v6e:2x2x1
jax: 0.10.0
libtpu: 0.0.40
codegen_flags: <defaults>
</compile_context>

<pallas_src>
import functools

import jax
import jax.numpy as jnp
from jax import lax
from jax.experimental import pallas as pl
from jax.experimental.pallas import tpu as pltpu

SEQ = 2        # input features (seq = 2 in the PyTorch script)
HIDDEN = 15
OUT = 1
LANE = 128     # TPU lane width
PCOLS = SEQ + 2      # packed params: [w1t_0, w1t_1, b1, w2]
PROWS = HIDDEN + 1   # + one row for the folded affine constants [c_0, c_1, d, 0]


def _round_up(n, m):
    return ((n + m - 1) // m) * m


def _pick_tile(B, block_b):
    """Batch tile (lanes per grid step)."""
    block_b = _round_up(max(block_b, LANE), LANE)
    bp_min = _round_up(B, LANE)
    if bp_min <= block_b:
        return bp_min                      # whole batch fits in one tile
    tb = block_b
    # v7x has 2 TensorCores sharing the "parallel" grid axis: prefer >= 8 grid
    # steps when the batch allows it, but never shrink below 32768 lanes/step
    # or the ~0.35us per-step overhead starts to dominate again.
    while tb > 32768 and -(-B // tb) < 8:
        tb //= 2
    return tb


def _pick_chunk(tb):
    """Largest lane chunk (<= 1024) dividing the tile: the per-chunk
    h -> tanh -> weighted-sum chain then stays entirely in vregs."""
    for c in (1024, 512, 256, 128):
        if tb % c == 0:
            return c
    return tb


def _mlp_kernel(x_ref, p_ref, o_ref, *, chunk, compute_dtype):
    # x_ref : (SEQ, TB)       batch on lanes (lane-dense loads)
    # p_ref : (PROWS, PCOLS)  packed parameters, resident in VMEM
    # o_ref : (OUT, TB)       lane-dense output
    p = p_ref[...]
    w1t = p[:HIDDEN, :SEQ].astype(compute_dtype)           # (15, 2)
    b1 = p[:HIDDEN, SEQ:SEQ + 1].astype(compute_dtype)     # (15, 1)
    w2 = p[:HIDDEN, SEQ + 1:SEQ + 2]                        # (15, 1), f32 accumulate
    c = p[HIDDEN:PROWS, :SEQ]                               # (1, 2),  f32
    d = p[HIDDEN:PROWS, SEQ:SEQ + 1]                        # (1, 1),  f32

    n_chunks = x_ref.shape[-1] // chunk

    def body(i, carry):
        off = pl.multiple_of(i * chunk, chunk)
        x = x_ref[:, pl.ds(off, chunk)]                     # (SEQ, chunk)
        xf = x.astype(jnp.float32)
        xc = x if x.dtype == compute_dtype else x.astype(compute_dtype)

        # Layer 1: unrolled K=2 broadcast-FMAs on the VPU (the MXU would be
        # <1% utilized at these shapes).
        h = b1 + sum(w1t[:, k:k + 1] * xc[k:k + 1, :] for k in range(SEQ))
        t = jnp.tanh(h)                                     # EUP slot

        # Tanhshrink + Linear2 with the affine half folded into (c, d):
        #   y = c.x + d - sum_j w2_j * tanh(h_j)
        s = jnp.sum(w2 * t.astype(jnp.float32), axis=0, keepdims=True)   # (1, chunk)
        lin = d + sum(c[:, k:k + 1] * xf[k:k + 1, :] for k in range(SEQ))
        o_ref[:, pl.ds(off, chunk)] = (lin - s).astype(o_ref.dtype)
        return carry

    lax.fori_loop(0, n_chunks, body, 0)


def _pack_params(w1, b1, w2, b2):
    """Pack [W1^T | b1 | w2] plus the folded affine constants into one (16, 4)
    f32 block: row j < 15 -> [w1[0,j], w1[1,j], b1[j], w2[j]];
    row 15 -> [c_0, c_1, d, 0] with c = W1 @ w2, d = w2.b1 + b2."""
    w1 = jnp.asarray(w1, jnp.float32).reshape(SEQ, HIDDEN)
    b1 = jnp.asarray(b1, jnp.float32).reshape(HIDDEN)
    w2 = jnp.asarray(w2, jnp.float32).reshape(HIDDEN)
    b2 = jnp.asarray(b2, jnp.float32).reshape(())
    c = w1 @ w2                                             # (SEQ,)
    d = jnp.dot(w2, b1) + b2                                # scalar
    top = jnp.concatenate([w1.T, b1[:, None], w2[:, None]], axis=1)        # (15, 4)
    bot = jnp.concatenate(
        [c[None, :], d.reshape(1, 1), jnp.zeros((1, 1), jnp.float32)], axis=1)
    return jnp.concatenate([top, bot], axis=0)              # (16, 4)


def net_forward_fmajor(xt, w1, b1, w2, b2, *, block_b=65536,
                       compute_dtype=jnp.float32):
    """Feature-major entry point.  xt: (SEQ, B) with batch on the fast axis.
    Returns (B, OUT) float32.  compute_dtype=jnp.bfloat16 enables the bf16
    compute path (v6e/v7x only; results then differ from the f32 reference)."""
    assert xt.ndim == 2 and xt.shape[0] == SEQ
    B = xt.shape[1]
    params = _pack_params(w1, b1, w2, b2)

    tb = _pick_tile(B, block_b)
    bp = _round_up(B, tb)
    chunk = _pick_chunk(tb)

    xt = jnp.asarray(xt, compute_dtype)
    if bp != B:
        xt = jnp.pad(xt, ((0, 0), (0, bp - B)))   # zero lanes, sliced off below

    kernel = functools.partial(_mlp_kernel, chunk=chunk, compute_dtype=compute_dtype)
    yt = pl.pallas_call(
        kernel,
        out_shape=jax.ShapeDtypeStruct((OUT, bp), jnp.float32),
        grid=(bp // tb,),
        in_specs=[
            pl.BlockSpec((SEQ, tb), lambda i: (0, i)),       # x tile, batch on lanes
            pl.BlockSpec((PROWS, PCOLS), lambda i: (0, 0)),  # packed params, resident
        ],
        out_specs=pl.BlockSpec((OUT, tb), lambda i: (0, i)),
        compiler_params=pltpu.CompilerParams(
            dimension_semantics=("parallel",),               # megacore shard on v7x
            vmem_limit_bytes=32 * 1024 * 1024,               # well under v7x's 64 MiB
        ),
        cost_estimate=pl.CostEstimate(
            flops=bp * (2 * SEQ * HIDDEN + 2 * HIDDEN + 2 * SEQ),
            transcendentals=bp * HIDDEN,
            bytes_accessed=bp * (SEQ * xt.dtype.itemsize + OUT * 4),
        ),
    )(xt, params)

    # (1, B) row-major == (B, 1) row-major: pure reshape, no transpose pass.
    return yt[:, :B].reshape(B, OUT)


def net_forward(x, w1, b1, w2, b2, *, block_b=65536, compute_dtype=jnp.float32):
    """PyTorch-layout entry point: x is (B, SEQ) float32, returns (B, OUT).
    Pays one XLA transpose to put batch on the lane axis; callers that can
    produce (SEQ, B) directly should use net_forward_fmajor and skip it."""
    x = jnp.asarray(x, jnp.float32)
    assert x.ndim == 2 and x.shape[1] == SEQ
    return net_forward_fmajor(x.T, w1, b1, w2, b2,
                              block_b=block_b, compute_dtype=compute_dtype)


def init_params(key):
    # Mirrors nn.Linear's U(-1/sqrt(fan_in), 1/sqrt(fan_in)) init.
    k1, k2, k3, k4 = jax.random.split(key, 4)
    s1 = 1.0 / jnp.sqrt(SEQ)
    s2 = 1.0 / jnp.sqrt(HIDDEN)
    w1 = jax.random.uniform(k1, (SEQ, HIDDEN), jnp.float32, -s1, s1)
    b1 = jax.random.uniform(k2, (HIDDEN,), jnp.float32, -s1, s1)
    w2 = jax.random.uniform(k3, (HIDDEN, OUT), jnp.float32, -s2, s2)
    b2 = jax.random.uniform(k4, (OUT,), jnp.float32, -s2, s2)
    return w1, b1, w2, b2


def _reference(x, w1, b1, w2, b2):
    # Same math as the PyTorch module (Linear -> Tanhshrink -> Linear), pure JAX.
    h = x @ w1 + b1[None, :]
    h = h - jnp.tanh(h)
    return h @ w2 + b2[None, :]


if __name__ == "__main__":
    key = jax.random.PRNGKey(0)
    kx, kp = jax.random.split(key)
    w1, b1, w2, b2 = init_params(kp)

    # Small shape consistent with the module (batch=8, seq=2), jitted end to end.
    B = 8
    x = jax.random.normal(kx, (B, SEQ), jnp.float32)
    fwd = jax.jit(net_forward)
    out = jax.block_until_ready(fwd(x, w1, b1, w2, b2))
    ref = _reference(x, w1, b1, w2, b2)
    assert out.shape == (B, OUT)
    assert jnp.allclose(out, ref, atol=1e-5, rtol=1e-5)

    # Exercise the padded / multi-chunk path (single tile, 3 x 1024-lane chunks)
    # and the multi-tile "parallel" grid path (3 grid steps).
    B2 = 3000
    x2 = jax.random.normal(kx, (B2, SEQ), jnp.float32)
    out2 = jax.block_until_ready(net_forward(x2, w1, b1, w2, b2))
    out3 = jax.block_until_ready(net_forward(x2, w1, b1, w2, b2, block_b=1024))
    ref2 = _reference(x2, w1, b1, w2, b2)
    assert jnp.allclose(out2, ref2, atol=1e-5, rtol=1e-5)
    assert jnp.allclose(out3, ref2, atol=1e-5, rtol=1e-5)

    print("KERNEL_OK")
</pallas_src>

<mosaic_0001>
module attributes {stable_mosaic.version = 11 : i64} {
  func.func @_mlp_kernel(%arg0: i32, %arg1: memref<2x128xf32, #tpu.memory_space<vmem>>, %arg2: memref<16x4xf32, #tpu.memory_space<vmem>>, %arg3: memref<1x128xf32, #tpu.memory_space<vmem>>) attributes {dimension_semantics = [#tpu.dimension_semantics<parallel>], iteration_bounds = array<i64: 1>, scalar_prefetch = 0 : i64, scratch_operands = 0 : i64, tpu.core_type = #tpu.core_type<tc>, window_params = [{transform_indices = @transform_0, window_bounds = array<i64: 2, 128>}, {pipeline_mode = #tpu.pipeline_mode<synchronous>, transform_indices = @transform_1, window_bounds = array<i64: 16, 4>}, {transform_indices = @transform_2, window_bounds = array<i64: 1, 128>}]} {
    %c0 = arith.constant 0 : index
    %c0_0 = arith.constant 0 : index
    %0 = vector.load %arg2[%c0, %c0_0] : memref<16x4xf32, #tpu.memory_space<vmem>>, vector<16x4xf32>
    %1 = vector.extract_strided_slice %0 {offsets = [0, 0], sizes = [15, 2], strides = [1, 1]} : vector<16x4xf32> to vector<15x2xf32>
    %2 = vector.extract_strided_slice %0 {offsets = [0, 2], sizes = [15, 1], strides = [1, 1]} : vector<16x4xf32> to vector<15x1xf32>
    %3 = vector.extract_strided_slice %0 {offsets = [0, 3], sizes = [15, 1], strides = [1, 1]} : vector<16x4xf32> to vector<15x1xf32>
    %4 = vector.extract_strided_slice %0 {offsets = [15, 0], sizes = [1, 2], strides = [1, 1]} : vector<16x4xf32> to vector<1x2xf32>
    %5 = vector.extract_strided_slice %0 {offsets = [15, 2], sizes = [1, 1], strides = [1, 1]} : vector<16x4xf32> to vector<1x1xf32>
    %c0_i32 = arith.constant 0 : i32
    %c128_i32 = arith.constant 128 : i32
    %6 = arith.muli %c0_i32, %c128_i32 : i32
    %7 = tpu.assume_multiple %6, 128 : i32
    %c0_1 = arith.constant 0 : index
    %8 = arith.index_cast %7 : i32 to index
    %9 = vector.load %arg1[%c0_1, %8] : memref<2x128xf32, #tpu.memory_space<vmem>>, vector<2x128xf32>
    %10 = vector.extract_strided_slice %1 {offsets = [0, 0], sizes = [15, 1], strides = [1, 1]} : vector<15x2xf32> to vector<15x1xf32>
    %11 = vector.extract_strided_slice %9 {offsets = [0, 0], sizes = [1, 128], strides = [1, 1]} : vector<2x128xf32> to vector<1x128xf32>
    %12 = vector.broadcast %10 : vector<15x1xf32> to vector<15x128xf32>
    %13 = vector.broadcast %11 : vector<1x128xf32> to vector<15x128xf32>
    %14 = arith.mulf %12, %13 : vector<15x128xf32>
    %cst = arith.constant 0.000000e+00 : f32
    %15 = vector.broadcast %cst : f32 to vector<15x128xf32>
    %16 = arith.addf %15, %14 : vector<15x128xf32>
    %17 = vector.extract_strided_slice %1 {offsets = [0, 1], sizes = [15, 1], strides = [1, 1]} : vector<15x2xf32> to vector<15x1xf32>
    %18 = vector.extract_strided_slice %9 {offsets = [1, 0], sizes = [1, 128], strides = [1, 1]} : vector<2x128xf32> to vector<1x128xf32>
    %19 = vector.broadcast %17 : vector<15x1xf32> to vector<15x128xf32>
    %20 = vector.broadcast %18 : vector<1x128xf32> to vector<15x128xf32>
    %21 = arith.mulf %19, %20 : vector<15x128xf32>
    %22 = arith.addf %16, %21 : vector<15x128xf32>
    %23 = vector.broadcast %2 : vector<15x1xf32> to vector<15x128xf32>
    %24 = arith.addf %23, %22 : vector<15x128xf32>
    %25 = math.tanh %24 : vector<15x128xf32>
    %26 = vector.broadcast %3 : vector<15x1xf32> to vector<15x128xf32>
    %27 = arith.mulf %26, %25 : vector<15x128xf32>
    %cst_2 = arith.constant dense<0.000000e+00> : vector<128xf32>
    %28 = vector.multi_reduction <add>, %27, %cst_2 [0] : vector<15x128xf32> to vector<128xf32>
    %29 = vector.shape_cast %28 : vector<128xf32> to vector<1x128xf32>
    %30 = vector.extract_strided_slice %4 {offsets = [0, 0], sizes = [1, 1], strides = [1, 1]} : vector<1x2xf32> to vector<1x1xf32>
    %31 = vector.extract_strided_slice %9 {offsets = [0, 0], sizes = [1, 128], strides = [1, 1]} : vector<2x128xf32> to vector<1x128xf32>
    %32 = vector.broadcast %30 : vector<1x1xf32> to vector<1x128xf32>
    %33 = arith.mulf %32, %31 : vector<1x128xf32>
    %cst_3 = arith.constant 0.000000e+00 : f32
    %34 = vector.broadcast %cst_3 : f32 to vector<1x128xf32>
    %35 = arith.addf %34, %33 : vector<1x128xf32>
    %36 = vector.extract_strided_slice %4 {offsets = [0, 1], sizes = [1, 1], strides = [1, 1]} : vector<1x2xf32> to vector<1x1xf32>
    %37 = vector.extract_strided_slice %9 {offsets = [1, 0], sizes = [1, 128], strides = [1, 1]} : vector<2x128xf32> to vector<1x128xf32>
    %38 = vector.broadcast %36 : vector<1x1xf32> to vector<1x128xf32>
    %39 = arith.mulf %38, %37 : vector<1x128xf32>
    %40 = arith.addf %35, %39 : vector<1x128xf32>
    %41 = vector.broadcast %5 : vector<1x1xf32> to vector<1x128xf32>
    %42 = arith.addf %41, %40 : vector<1x128xf32>
    %43 = arith.subf %42, %29 : vector<1x128xf32>
    %c0_4 = arith.constant 0 : index
    %44 = arith.index_cast %7 : i32 to index
    %45 = vector.load %arg3[%c0_4, %44] : memref<1x128xf32, #tpu.memory_space<vmem>>, vector<1x128xf32>
    tpu.vector_store %arg3[%c0_4, %44], %43 {strides = array<i32>} : memref<1x128xf32, #tpu.memory_space<vmem>>, vector<1x128xf32>,
    %c1_i32 = arith.constant 1 : i32
    return
  }
  func.func @transform_0(%arg0: i32) -> (i32, i32) {
    %c0_i32 = arith.constant 0 : i32
    %c0_i32_0 = arith.constant 0 : i32
    return %c0_i32, %arg0 : i32, i32
  }
  func.func @transform_1(%arg0: i32) -> (i32, i32) {
    %c0_i32 = arith.constant 0 : i32
    %c0_i32_0 = arith.constant 0 : i32
    %c0_i32_1 = arith.constant 0 : i32
    return %c0_i32, %c0_i32_0 : i32, i32
  }
  func.func @transform_2(%arg0: i32) -> (i32, i32) {
    %c0_i32 = arith.constant 0 : i32
    %c0_i32_0 = arith.constant 0 : i32
    return %c0_i32, %arg0 : i32, i32
  }
}

</mosaic_0001>

<bundles_post_ra>
// kernel: net_forward.1
= control target key start
LH: loop header
LB: loop body
LE: loop exit
PB: predicated region body
PF: predicated region fallthrough
CT: control target
= control target key end

     0   :  { %v111_v0 = vmov 0   ;;  %v112_v3 = vmov 1   ;;  %v113_v4 = vmov 2   ;;  %v114_v5 = vmov 3   ;;  %s142_s1 = inlined_call_operand.vmem [shape: f32[16,4], index: 1, kind: input, shape index: {}]   ;;  %s143_s0 = inlined_call_operand.vmem [shape: f32[2,128], index: 0, kind: input, shape index: {}]   ;;  %s144_s2 = inlined_call_operand.vmem [shape: f32[1,128], index: 2, kind: output, shape index: {}]  }
   0x1   :  { %101 = vset.pattern.permute.xlu1 %v111_v0  ;;  %99 = vset.pattern.permute.xlu0 %v111_v0  ;;  %v12_v1 = vld [vmem:[%s142_s1 + $0x8] sm:$0xff]  ;;  %v11_v2 = vld [vmem:[%s142_s1] sm:$0xff]  ;;  %v24_v6 = vlaneseq  ;;  %vm70_vm0 = vcmask 1046528  }
   0x2   :  { %21 = vperm.xlu0 %99, %v12_v1   ;;  %16 = vperm.xlu1 %101, %v11_v2   ;;  %v13_v10 = vld [vmem:[%s143_s0] sm:$0x3] }
   0x3   :  { %v25_v7 = vshrl.u32 %v24_v6, 7  ;;  %v84_v34 = vrot.slane %v13_v10, 2  ;;  %v80_v36 = vrot.slane %v13_v10, 1 }
   0x5   :  { %v26_v8 = vsub.s32 0, %v25_v7  ;;  %v42_v9 = vsub.s32 1, %v25_v7 }
   0x6   :  { %100 = vset.pattern.permute.xlu0 %v112_v3  ;;  %102 = vset.pattern.permute.xlu1 %v112_v3 }
   0x7   :  { %37 = vperm.xlu0 %100, %v12_v1   ;;  %33 = vperm.xlu1 %102, %v11_v2   ;;  %v27_v13 = vrot.slane %v13_v10, %v26_v8  ;;  %v43_v14 = vrot.slane %v13_v10, %v42_v9 }
   0xb   :  { %104 = vset.pattern.permute.xlu0 %v113_v4  ;;  %103 = vset.pattern.permute.xlu1 %v113_v4 }
   0xc   :  { %49 = vperm.xlu0 %104, %v11_v2   ;;  %53 = vperm.xlu1 %103, %v12_v1  }
  0x10   :  { %105 = vset.pattern.permute.xlu1 %v114_v5  ;;  %106 = vset.pattern.permute.xlu0 %v114_v5 }
  0x11   :  { %65 = vperm.xlu1 %105, %v12_v1  }
  0x15   :  { %61 = vperm.xlu1 %105, %v11_v2  }
  0x7d   :  { %v17_v11 = vpop.permute.xlu1 %16  ;;  %v22_v12 = vpop.permute.xlu0 %21 }
  0x7e   :  { %v28_v17 = vmul.f32 %v27_v13, %v17_v11  ;;  %v29_v18 = vmul.f32 %v27_v13, %v22_v12  ;;  %v82_v40 = vmul.f32 %v80_v36, %v22_v12 }
  0x82   :  { %v38_v15 = vpop.permute.xlu0 %37  ;;  %v34_v16 = vpop.permute.xlu1 %33 }
  0x83   :  { %v45_v19 = vmul.f32 %v43_v14, %v38_v15  ;;  %v44_v20 = vmul.f32 %v43_v14, %v34_v16  ;;  %v86_v38 = vmul.f32 %v84_v34, %v38_v15 }
  0x85   :  { %v46_v21 = vadd.f32 %v44_v20, %v28_v17  ;;  %v47_v22 = vadd.f32 %v45_v19, %v29_v18  ;;  %v87_v42 = vadd.f32 %v86_v38, %v82_v40 }
  0x87   :  { %v50_v23 = vpop.permute.xlu0 %49  ;;  %v54_v24 = vpop.permute.xlu1 %53 }
  0x88   :  { %v56_v25 = vadd.f32 %v50_v23, %v46_v21  ;;  %v57_v26 = vadd.f32 %v54_v24, %v47_v22  ;;  %v88_v45 = vadd.f32 %v87_v42, %v54_v24 }
  0x8a   :  { %107 = vtanh.f32 %v56_v25 }
  0x8b   :  { %109 = vtanh.f32 %v57_v26 }
  0x8c   :  { %v66_v27 = vpop.permute.xlu1 %65 }
  0x90   :  { %v62_v29 = vpop.permute.xlu1 %61 }
  0x97   :  { %v108_v28 = vpop.eup %107 }
  0x98   :  { %v110_v30 = vpop.eup %109  ;;  %v68_v31 = vmul.f32 %v108_v28, %v62_v29 }
  0x99   :  { %v69_v32 = vmul.f32 %v110_v30, %v66_v27 }
  0x9b   :  { %v71_v33 = vsel %vm70_vm0, %v69_v32, 0.0 }
  0x9c   :  { %v72_v35 = vadd.f32 %v71_v33, %v68_v31 }
  0x9e   :  { %v73_v37 = vrot.slane %v72_v35, 4 }
  0xa0   :  { %v74_v39 = vadd.f32 %v73_v37, %v72_v35 }
  0xa2   :  { %v75_v41 = vrot.slane %v74_v39, 2 }
  0xa4   :  { %v76_v43 = vadd.f32 %v75_v41, %v74_v39 }
  0xa6   :  { %v77_v44 = vrot.slane %v76_v43, 1 }
  0xa8   :  { %v78_v46 = vadd.f32 %v77_v44, %v76_v43 }
  0xaa   :  { %v89_v47 = vsub.f32 %v88_v45, %v78_v46 }
  0xac   :  { %90 = vst [vmem:[%s144_s2 - $0x7] sm:$0x80] %v89_v47 }

</bundles_post_ra>
